<compile_context>
chip_gen: v7x
topology: tpu7x:2x2x1
jax: 0.10.0
libtpu: 0.0.40
codegen_flags: <defaults>
</compile_context>

<pallas_src>
import functools

import jax
import jax.numpy as jnp
from jax import lax
from jax.experimental import pallas as pl
from jax.experimental.pallas import tpu as pltpu

LANES = 128
TARGET_BLOCK_BYTES = 4 * 1024 * 1024   # ~4 MiB of native-dtype data per input block
MAX_TILE_ROWS = 8192                   # caps in-kernel f32-upcast temporary footprint
VMEM_LIMIT_BYTES = 48 * 1024 * 1024    # 2 inputs x 2 buffers + f32 temps + headroom
MAX_SLICES = 2                         # at most one slice per TensorCore


def _num_tensorcores() -> int:
    """Best-effort TensorCores-per-device: 1 on v5e/v6e, 2 on v7x."""
    try:
        info = pltpu.get_tpu_info()
        for attr in ("num_cores", "num_tensorcores", "tensorcores_per_chip",
                     "cores_per_chip", "core_count"):
            v = getattr(info, attr, None)
            if isinstance(v, int) and v > 0:
                return int(v)
    except Exception:
        pass
    return 1


def _masked_mse_kernel(pred_ref, true_ref, sq_ref, cnt_ref, *, rows, tile_rows):
    c = pl.program_id(0)          # slice (core) index       -- 'parallel'
    j = pl.program_id(1)          # tile index inside slice  -- 'arbitrary'
    steps = pl.num_programs(1)

    @pl.when(j == 0)
    def _():
        sq_ref[...] = jnp.zeros_like(sq_ref)
        cnt_ref[...] = jnp.zeros_like(cnt_ref)

    # Upcast in-kernel; inputs travel HBM->VMEM in their native dtype.
    t = true_ref[...].astype(jnp.float32)
    p = pred_ref[...].astype(jnp.float32)

    observed = jnp.logical_not(jnp.isnan(t))
    # torch semantics: observed -> (t - p); unobserved -> (p - p), which keeps a
    # NaN/Inf prediction at an unobserved label NaN (as torch's p*0 does) and is
    # exactly 0 for finite p.  One VALU op cheaper than where(obs, t-p, p*0).
    diff = jnp.where(observed, t, p) - p
    obs_f = observed.astype(jnp.float32)

    def accumulate(d, v):
        # Fold the (tile_rows, 128) tile into the resident (1, 8, 128) blocks:
        # pure elementwise VPU adds; the single cross-lane/sublane reduce is
        # deferred to the wrapper.
        sq_ref[...] += (d * d).reshape(tile_rows // 8, 8, LANES).sum(axis=0)[None]
        cnt_ref[...] += v.reshape(tile_rows // 8, 8, LANES).sum(axis=0)[None]

    # Rows of this tile holding real data.  `rows` is a row count (numel // 128),
    # so this index math is safe from int32 overflow for any HBM-sized input.
    # limit <= 0 also covers the clamped duplicated tiles of the last slice.
    tile_idx = c * steps + j
    limit = rows - tile_idx * tile_rows

    @pl.when(limit >= tile_rows)
    def _():
        # Fast path (all but at most one tile per slice): no index masking at all.
        accumulate(diff, obs_f)

    @pl.when(limit < tile_rows)
    def _():
        # Slow path: partial last tile (garbage rows from the clipped DMA) or a
        # duplicated clamped tile (limit <= 0) -- mask by row index.
        row_ids = lax.broadcasted_iota(jnp.int32, (tile_rows, LANES), 0)
        in_bounds = row_ids < limit
        accumulate(jnp.where(in_bounds, diff, 0.0),
                   jnp.where(in_bounds, obs_f, 0.0))


def _run_kernel(pred2d, true2d, rows):
    itemsize = max(jnp.dtype(pred2d.dtype).itemsize, jnp.dtype(true2d.dtype).itemsize)
    # Bytes-based tile: ~4 MiB of native-dtype input per block (8192 f32 rows),
    # capped so the in-kernel f32 temporaries stay bounded for narrow dtypes.
    block_rows = max(8, ((TARGET_BLOCK_BYTES // (LANES * itemsize)) // 8) * 8)
    block_rows = min(block_rows, MAX_TILE_ROWS)
    tile_rows = min(block_rows, ((rows + 7) // 8) * 8)
    total_tiles = pl.cdiv(rows, tile_rows)

    cores = min(_num_tensorcores(), MAX_SLICES)
    num_slices = cores if (cores > 1 and total_tiles >= cores) else 1
    steps = pl.cdiv(total_tiles, num_slices)

    def in_map(c, j):
        # Clamp so the duplicated trailing tile of the last slice never indexes
        # past the array; its contribution is zeroed by the in-kernel mask.
        return (jnp.minimum(c * steps + j, total_tiles - 1), 0)

    acc_shape = jax.ShapeDtypeStruct((num_slices, 8, LANES), jnp.float32)
    acc_spec = pl.BlockSpec((1, 8, LANES), lambda c, j: (c, 0, 0))

    kernel = functools.partial(_masked_mse_kernel, rows=rows, tile_rows=tile_rows)
    in_bytes = rows * LANES * (jnp.dtype(pred2d.dtype).itemsize
                               + jnp.dtype(true2d.dtype).itemsize)
    cost = pl.CostEstimate(
        flops=8 * rows * LANES,
        transcendentals=0,
        bytes_accessed=in_bytes + 2 * num_slices * 8 * LANES * 4,
    )

    # TODO(synk): verify in xprof that the 'parallel' leading axis really shards
    # the two slices across both v7x TensorCores; if not, switch to
    # pltpu.CORE_PARALLEL for that axis.
    return pl.pallas_call(
        kernel,
        out_shape=(acc_shape, acc_shape),
        grid_spec=pltpu.PrefetchScalarGridSpec(
            num_scalar_prefetch=0,
            grid=(num_slices, steps),
            in_specs=[
                pl.BlockSpec((tile_rows, LANES), in_map),
                pl.BlockSpec((tile_rows, LANES), in_map),
            ],
            out_specs=(acc_spec, acc_spec),
        ),
        compiler_params=pltpu.CompilerParams(
            dimension_semantics=("parallel", "arbitrary"),
            # Explicit limit so large tiles don't trip v5e's 16 MiB default
            # scoped-VMEM; stays under v7x's 64 MiB physical VMEM.
            vmem_limit_bytes=VMEM_LIMIT_BYTES,
        ),
        cost_estimate=cost,
    )(pred2d, true2d)


def custom_mse_loss(y_pred, y_true):
    assert y_pred.shape == y_true.shape
    numel = int(y_pred.size)
    if numel == 0:
        # TODO(synk): torch returns NaN (mean of empty) * 0 here; define it as 0.
        return jnp.float32(0.0)

    pred_f = jnp.ravel(y_pred)
    true_f = jnp.ravel(y_true)

    rows = numel // LANES
    tail = numel - rows * LANES

    # Ragged (<128 element) tail handled with plain jnp -- avoids the previous
    # whole-array concatenate/pad copy for non-128-aligned sizes.
    if tail:
        pt = pred_f[rows * LANES:].astype(jnp.float32)
        tt = true_f[rows * LANES:].astype(jnp.float32)
        t_obs = jnp.logical_not(jnp.isnan(tt))
        t_diff = jnp.where(t_obs, tt, pt) - pt
        tail_sq = jnp.sum(t_diff * t_diff)
        tail_cnt = jnp.sum(t_obs.astype(jnp.float32))
    else:
        tail_sq = jnp.float32(0.0)
        tail_cnt = jnp.float32(0.0)

    if rows == 0:
        sq = tail_sq
        cnt = tail_cnt
    else:
        if tail:
            pred2d = pred_f[: rows * LANES].reshape(rows, LANES)
            true2d = true_f[: rows * LANES].reshape(rows, LANES)
        else:
            # 128-aligned case: pure reshape, no copy.
            pred2d = pred_f.reshape(rows, LANES)
            true2d = true_f.reshape(rows, LANES)
        sq_parts, cnt_parts = _run_kernel(pred2d, true2d, rows)
        sq = jnp.sum(sq_parts) + tail_sq
        cnt = jnp.sum(cnt_parts) + tail_cnt

    n = jnp.float32(numel)
    factor = jnp.where(cnt == 0.0, jnp.float32(0.0), n / cnt)
    return (sq / n) * factor


def _reference(y_pred, y_true):
    mask = jnp.logical_not(jnp.isnan(y_true))
    cnt = jnp.sum(mask)
    numel = jnp.float32(y_true.size)
    factor = jnp.where(cnt == 0, jnp.float32(0.0), numel / cnt.astype(jnp.float32))
    y_true_c = jnp.where(jnp.isnan(y_true), jnp.ones_like(y_true), y_true)
    m = mask.astype(jnp.float32)
    return jnp.mean((y_true_c * m - y_pred * m) ** 2) * factor


if __name__ == "__main__":
    key = jax.random.PRNGKey(0)
    k1, k2, k3 = jax.random.split(key, 3)
    shape = (2, 4, 16, 16)
    y_pred = jax.random.normal(k1, shape, dtype=jnp.float32)
    y_true = jax.random.normal(k2, shape, dtype=jnp.float32)
    # inject NaNs (non-observed labels) into ~30% of y_true
    nan_mask = jax.random.uniform(k3, shape) < 0.3
    y_true = jnp.where(nan_mask, jnp.nan, y_true)

    loss = custom_mse_loss(y_pred, y_true)
    jax.block_until_ready(loss)

    ref = _reference(y_pred, y_true)
    assert jnp.allclose(loss, ref, rtol=1e-5, atol=1e-6), (loss, ref)

    # Second check: non-multiple-of-tile row count exercises the masked slow path.
    shape2 = (2, 4, 17, 16)
    k4, k5, k6 = jax.random.split(jax.random.PRNGKey(1), 3)
    y_pred2 = jax.random.normal(k4, shape2, dtype=jnp.float32)
    y_true2 = jnp.where(jax.random.uniform(k6, shape2) < 0.3, jnp.nan,
                        jax.random.normal(k5, shape2, dtype=jnp.float32))
    loss2 = custom_mse_loss(y_pred2, y_true2)
    jax.block_until_ready(loss2)
    ref2 = _reference(y_pred2, y_true2)
    assert jnp.allclose(loss2, ref2, rtol=1e-5, atol=1e-6), (loss2, ref2)

    print("KERNEL_OK")
</pallas_src>

<mosaic_0001>
module attributes {stable_mosaic.version = 11 : i64} {
  func.func @_masked_mse_kernel(%arg0: i32, %arg1: i32, %arg2: memref<16x128xf32, #tpu.memory_space<vmem>>, %arg3: memref<16x128xf32, #tpu.memory_space<vmem>>, %arg4: memref<1x8x128xf32, #tpu.memory_space<vmem>>, %arg5: memref<1x8x128xf32, #tpu.memory_space<vmem>>) attributes {dimension_semantics = [#tpu.dimension_semantics<parallel>, #tpu.dimension_semantics<arbitrary>], iteration_bounds = array<i64: 1, 1>, scalar_prefetch = 0 : i64, scratch_operands = 0 : i64, tpu.core_type = #tpu.core_type<tc>, window_params = [{transform_indices = @transform_0, window_bounds = array<i64: 16, 128>}, {transform_indices = @transform_1, window_bounds = array<i64: 16, 128>}, {transform_indices = @transform_2, window_bounds = array<i64: 1, 8, 128>}, {transform_indices = @transform_3, window_bounds = array<i64: 1, 8, 128>}]} {
    %c0_i32 = arith.constant 0 : i32
    %0 = arith.cmpi eq, %arg1, %c0_i32 : i32
    %1 = arith.extui %0 : i1 to i32
    %c0_i32_0 = arith.constant 0 : i32
    %2 = arith.cmpi ne, %1, %c0_i32_0 : i32
    scf.if %2 {
      %cst_9 = arith.constant 0.000000e+00 : f32
      %21 = vector.broadcast %cst_9 : f32 to vector<1x8x128xf32>
      %c0_10 = arith.constant 0 : index
      %c0_11 = arith.constant 0 : index
      %c0_12 = arith.constant 0 : index
      %22 = vector.load %arg4[%c0_10, %c0_11, %c0_12] : memref<1x8x128xf32, #tpu.memory_space<vmem>>, vector<1x8x128xf32>
      tpu.vector_store %arg4[%c0_10, %c0_11, %c0_12], %21 {strides = array<i32>} : memref<1x8x128xf32, #tpu.memory_space<vmem>>, vector<1x8x128xf32>,
      %cst_13 = arith.constant 0.000000e+00 : f32
      %23 = vector.broadcast %cst_13 : f32 to vector<1x8x128xf32>
      %c0_14 = arith.constant 0 : index
      %c0_15 = arith.constant 0 : index
      %c0_16 = arith.constant 0 : index
      %24 = vector.load %arg5[%c0_14, %c0_15, %c0_16] : memref<1x8x128xf32, #tpu.memory_space<vmem>>, vector<1x8x128xf32>
      tpu.vector_store %arg5[%c0_14, %c0_15, %c0_16], %23 {strides = array<i32>} : memref<1x8x128xf32, #tpu.memory_space<vmem>>, vector<1x8x128xf32>,
    } else {
    }
    %c0 = arith.constant 0 : index
    %c0_1 = arith.constant 0 : index
    %3 = vector.load %arg3[%c0, %c0_1] : memref<16x128xf32, #tpu.memory_space<vmem>>, vector<16x128xf32>
    %c0_2 = arith.constant 0 : index
    %c0_3 = arith.constant 0 : index
    %4 = vector.load %arg2[%c0_2, %c0_3] : memref<16x128xf32, #tpu.memory_space<vmem>>, vector<16x128xf32>
    %5 = arith.cmpf one, %3, %3 : vector<16x128xf32>
    %cst = arith.constant dense<true> : vector<16x128xi1>
    %6 = arith.xori %5, %cst : vector<16x128xi1>
    %7 = arith.select %6, %3, %4 : vector<16x128xi1>, vector<16x128xf32>
    %8 = arith.subf %7, %4 : vector<16x128xf32>
    %9 = arith.extui %6 : vector<16x128xi1> to vector<16x128xi32>
    %10 = arith.sitofp %9 : vector<16x128xi32> to vector<16x128xf32>
    %c1_i32 = arith.constant 1 : i32
    %11 = arith.muli %arg0, %c1_i32 : i32
    %12 = arith.addi %11, %arg1 : i32
    %c16_i32 = arith.constant 16 : i32
    %13 = arith.muli %12, %c16_i32 : i32
    %c16_i32_4 = arith.constant 16 : i32
    %14 = arith.subi %c16_i32_4, %13 : i32
    %c16_i32_5 = arith.constant 16 : i32
    %15 = arith.cmpi sge, %14, %c16_i32_5 : i32
    %16 = arith.extui %15 : i1 to i32
    %c0_i32_6 = arith.constant 0 : i32
    %17 = arith.cmpi ne, %16, %c0_i32_6 : i32
    scf.if %17 {
      %c0_9 = arith.constant 0 : index
      %c0_10 = arith.constant 0 : index
      %c0_11 = arith.constant 0 : index
      %21 = vector.load %arg4[%c0_9, %c0_10, %c0_11] : memref<1x8x128xf32, #tpu.memory_space<vmem>>, vector<1x8x128xf32>
      %22 = arith.mulf %8, %8 : vector<16x128xf32>
      %23 = vector.shape_cast %22 : vector<16x128xf32> to vector<2x8x128xf32>
      %cst_12 = arith.constant dense<0.000000e+00> : vector<8x128xf32>
      %24 = vector.multi_reduction <add>, %23, %cst_12 [0] : vector<2x8x128xf32> to vector<8x128xf32>
      %25 = vector.shape_cast %24 : vector<8x128xf32> to vector<1x8x128xf32>
      %26 = arith.addf %21, %25 : vector<1x8x128xf32>
      %c0_13 = arith.constant 0 : index
      %c0_14 = arith.constant 0 : index
      %c0_15 = arith.constant 0 : index
      %27 = vector.load %arg4[%c0_13, %c0_14, %c0_15] : memref<1x8x128xf32, #tpu.memory_space<vmem>>, vector<1x8x128xf32>
      tpu.vector_store %arg4[%c0_13, %c0_14, %c0_15], %26 {strides = array<i32>} : memref<1x8x128xf32, #tpu.memory_space<vmem>>, vector<1x8x128xf32>,
      %c0_16 = arith.constant 0 : index
      %c0_17 = arith.constant 0 : index
      %c0_18 = arith.constant 0 : index
      %28 = vector.load %arg5[%c0_16, %c0_17, %c0_18] : memref<1x8x128xf32, #tpu.memory_space<vmem>>, vector<1x8x128xf32>
      %29 = vector.shape_cast %10 : vector<16x128xf32> to vector<2x8x128xf32>
      %cst_19 = arith.constant dense<0.000000e+00> : vector<8x128xf32>
      %30 = vector.multi_reduction <add>, %29, %cst_19 [0] : vector<2x8x128xf32> to vector<8x128xf32>
      %31 = vector.shape_cast %30 : vector<8x128xf32> to vector<1x8x128xf32>
      %32 = arith.addf %28, %31 : vector<1x8x128xf32>
      %c0_20 = arith.constant 0 : index
      %c0_21 = arith.constant 0 : index
      %c0_22 = arith.constant 0 : index
      %33 = vector.load %arg5[%c0_20, %c0_21, %c0_22] : memref<1x8x128xf32, #tpu.memory_space<vmem>>, vector<1x8x128xf32>
      tpu.vector_store %arg5[%c0_20, %c0_21, %c0_22], %32 {strides = array<i32>} : memref<1x8x128xf32, #tpu.memory_space<vmem>>, vector<1x8x128xf32>,
    } else {
    }
    %c16_i32_7 = arith.constant 16 : i32
    %18 = arith.cmpi slt, %14, %c16_i32_7 : i32
    %19 = arith.extui %18 : i1 to i32
    %c0_i32_8 = arith.constant 0 : i32
    %20 = arith.cmpi ne, %19, %c0_i32_8 : i32
    scf.if %20 {
      %21 = tpu.iota {dimensions = array<i32: 0>} : vector<16x128xi32>
      %22 = vector.broadcast %14 : i32 to vector<16x128xi32>
      %23 = arith.cmpi slt, %21, %22 : vector<16x128xi32>
      %cst_9 = arith.constant 0.000000e+00 : f32
      %24 = vector.broadcast %cst_9 : f32 to vector<16x128xf32>
      %25 = arith.select %23, %8, %24 : vector<16x128xi1>, vector<16x128xf32>
      %cst_10 = arith.constant 0.000000e+00 : f32
      %26 = vector.broadcast %cst_10 : f32 to vector<16x128xf32>
      %27 = arith.select %23, %10, %26 : vector<16x128xi1>, vector<16x128xf32>
      %c0_11 = arith.constant 0 : index
      %c0_12 = arith.constant 0 : index
      %c0_13 = arith.constant 0 : index
      %28 = vector.load %arg4[%c0_11, %c0_12, %c0_13] : memref<1x8x128xf32, #tpu.memory_space<vmem>>, vector<1x8x128xf32>
      %29 = arith.mulf %25, %25 : vector<16x128xf32>
      %30 = vector.shape_cast %29 : vector<16x128xf32> to vector<2x8x128xf32>
      %cst_14 = arith.constant dense<0.000000e+00> : vector<8x128xf32>
      %31 = vector.multi_reduction <add>, %30, %cst_14 [0] : vector<2x8x128xf32> to vector<8x128xf32>
      %32 = vector.shape_cast %31 : vector<8x128xf32> to vector<1x8x128xf32>
      %33 = arith.addf %28, %32 : vector<1x8x128xf32>
      %c0_15 = arith.constant 0 : index
      %c0_16 = arith.constant 0 : index
      %c0_17 = arith.constant 0 : index
      %34 = vector.load %arg4[%c0_15, %c0_16, %c0_17] : memref<1x8x128xf32, #tpu.memory_space<vmem>>, vector<1x8x128xf32>
      tpu.vector_store %arg4[%c0_15, %c0_16, %c0_17], %33 {strides = array<i32>} : memref<1x8x128xf32, #tpu.memory_space<vmem>>, vector<1x8x128xf32>,
      %c0_18 = arith.constant 0 : index
      %c0_19 = arith.constant 0 : index
      %c0_20 = arith.constant 0 : index
      %35 = vector.load %arg5[%c0_18, %c0_19, %c0_20] : memref<1x8x128xf32, #tpu.memory_space<vmem>>, vector<1x8x128xf32>
      %36 = vector.shape_cast %27 : vector<16x128xf32> to vector<2x8x128xf32>
      %cst_21 = arith.constant dense<0.000000e+00> : vector<8x128xf32>
      %37 = vector.multi_reduction <add>, %36, %cst_21 [0] : vector<2x8x128xf32> to vector<8x128xf32>
      %38 = vector.shape_cast %37 : vector<8x128xf32> to vector<1x8x128xf32>
      %39 = arith.addf %35, %38 : vector<1x8x128xf32>
      %c0_22 = arith.constant 0 : index
      %c0_23 = arith.constant 0 : index
      %c0_24 = arith.constant 0 : index
      %40 = vector.load %arg5[%c0_22, %c0_23, %c0_24] : memref<1x8x128xf32, #tpu.memory_space<vmem>>, vector<1x8x128xf32>
      tpu.vector_store %arg5[%c0_22, %c0_23, %c0_24], %39 {strides = array<i32>} : memref<1x8x128xf32, #tpu.memory_space<vmem>>, vector<1x8x128xf32>,
    } else {
    }
    return
  }
  func.func @transform_0(%arg0: i32, %arg1: i32) -> (i32, i32) {
    %c1_i32 = arith.constant 1 : i32
    %0 = arith.muli %arg0, %c1_i32 : i32
    %1 = arith.addi %0, %arg1 : i32
    %c0_i32 = arith.constant 0 : i32
    %2 = arith.minsi %1, %c0_i32 : i32
    %c0_i32_0 = arith.constant 0 : i32
    %c0_i32_1 = arith.constant 0 : i32
    return %2, %c0_i32_0 : i32, i32
  }
  func.func @transform_1(%arg0: i32, %arg1: i32) -> (i32, i32) {
    %c1_i32 = arith.constant 1 : i32
    %0 = arith.muli %arg0, %c1_i32 : i32
    %1 = arith.addi %0, %arg1 : i32
    %c0_i32 = arith.constant 0 : i32
    %2 = arith.minsi %1, %c0_i32 : i32
    %c0_i32_0 = arith.constant 0 : i32
    %c0_i32_1 = arith.constant 0 : i32
    return %2, %c0_i32_0 : i32, i32
  }
  func.func @transform_2(%arg0: i32, %arg1: i32) -> (i32, i32, i32) {
    %c0_i32 = arith.constant 0 : i32
    %c0_i32_0 = arith.constant 0 : i32
    %c0_i32_1 = arith.constant 0 : i32
    return %arg0, %c0_i32, %c0_i32_0 : i32, i32, i32
  }
  func.func @transform_3(%arg0: i32, %arg1: i32) -> (i32, i32, i32) {
    %c0_i32 = arith.constant 0 : i32
    %c0_i32_0 = arith.constant 0 : i32
    %c0_i32_1 = arith.constant 0 : i32
    return %arg0, %c0_i32, %c0_i32_0 : i32, i32, i32
  }
}

</mosaic_0001>

<bundles_post_ra>
// kernel: tpu_custom_call.1
= control target key start
LH: loop header
LB: loop body
LE: loop exit
PB: predicated region body
PF: predicated region fallthrough
CT: control target
= control target key end

     0   :  { %9 = vsyncpa [#allocation3], 0  ;;  %s342_s0 = inlined_call_operand.hbm [shape: f32[16,128], index: 0, kind: input, shape index: {}]   ;;  %s343_s1 = inlined_call_operand.hbm [shape: f32[16,128], index: 1, kind: input, shape index: {}]   ;;  %s344_s2 = inlined_call_operand.hbm [shape: f32[1,8,128], index: 2, kind: output, shape index: {0}]   ;;  %s345_s3 = inlined_call_operand.hbm [shape: f32[1,8,128], index: 3, kind: output, shape index: {1}]  }
   0x1   :  { %10 = vsyncpa [#allocation6], 0 }
   0x2   :  { %11 = vsyncpa [#allocation4], 0 }
   0x3   :  { %12 = vsyncpa [#allocation9], 0  ;;  %s266_s12 = smov [#allocation2]   ;;  %s170_s16 = scalar_lea.hbm %s342_s0, 256 }
   0x4   :  { %s24_s13 = sshll.u32 %s266_s12, 4  ;;  %p171_p0 = scmp.ne.s32.totalorder %s342_s0, %s170_s16  ;;  %s25_s13 = int_to_ptr.vmem [resolvable:$true] %s24_s13 }
   0x5   :  { %p174_p1 = scmp.lt.u32.totalorder %s170_s16, %s342_s0 }
   0x7   :  { %p176_p2 = pnand %p174_p1, %p171_p0 }
   0x9   :  { %179 = shalt.err (!%p176_p2)
}
   0xa   :  { %s180_s21 = scalar_lea.vmem %s25_s13, 256  ;;  %p185_p4 = scmp.lt.s32.totalorder %s25_s13, %s25_s13 }
   0xb   :  { %p181_p3 = scmp.ne.s32.totalorder %s25_s13, %s180_s21  ;;  %p186_p5 = scmp.lt.s32.totalorder %s180_s21, %s180_s21 }
   0xd   :  { %p187_p6 = por %p186_p5, %p185_p4 }
   0xf   :  { %p188_p7 = pnand %p187_p6, %p181_p3 }
  0x11   :  { %191 = shalt.err (!%p188_p7)
}
  0x12   :  { %s267_s22 = smov 128   ;;  %s268_s23 = smov 8  }
  0x13   :  { %30 = dma.hbm_to_vmem [thread:$0]  %s342_s0, 256, %s25_s13, [#allocation3], %s267_s22, %s267_s22, %s268_s23  }
  0x14   :  { %s269_s26 = smov [#allocation5]   ;;  %s192_s30 = scalar_lea.hbm %s343_s1, 256 }
  0x15   :  { %s42_s27 = sshll.u32 %s269_s26, 4  ;;  %p193_p8 = scmp.ne.s32.totalorder %s343_s1, %s192_s30  ;;  %s43_s27 = int_to_ptr.vmem [resolvable:$true] %s42_s27 }
  0x16   :  { %p196_p9 = scmp.lt.u32.totalorder %s192_s30, %s343_s1 }
  0x18   :  { %p198_p10 = pnand %p196_p9, %p193_p8 }
  0x1a   :  { %201 = shalt.err (!%p198_p10)
}
  0x1b   :  { %s202_s8 = scalar_lea.vmem %s43_s27, 256  ;;  %p207_p12 = scmp.lt.s32.totalorder %s43_s27, %s43_s27 }
  0x1c   :  { %p203_p11 = scmp.ne.s32.totalorder %s43_s27, %s202_s8  ;;  %p208_p13 = scmp.lt.s32.totalorder %s202_s8, %s202_s8 }
  0x1e   :  { %p209_p0 = por %p208_p13, %p207_p12 }
  0x20   :  { %p210_p1 = pnand %p209_p0, %p203_p11 }
  0x22   :  { %213 = shalt.err (!%p210_p1)
}
  0x23   :  { %48 = dma.hbm_to_vmem [thread:$0]  %s343_s1, 256, %s43_s27, [#allocation6], %s267_s22, %s267_s22, %s268_s23  }
  0x24   :  { %258 = dma.done.wait [#allocation3], 256  }
  0x25   :  { %259 = vsyncadd [#allocation3], 4294967040 }
  0x26   :  { %260 = dma.done.wait [#allocation6], 256  }
  0x27   :  { %261 = vsyncadd [#allocation6], 4294967040  ;;  %v69_v0 = vld [vmem:[#allocation5] sm:$0xff]  ;;  %v70_v1 = vld [vmem:[#allocation5 + $0x8] sm:$0xff]  ;;  %vm270_vm2 = vmmov 1   ;;  %v271_v5 = vmov 0.0  }
  0x28   :  { %v71_v2 = vld [vmem:[#allocation2] sm:$0xff]  ;;  %v72_v3 = vld [vmem:[#allocation2 + $0x8] sm:$0xff]  ;;  %vm73_vm0 = vcmp.ne.f32.partialorder %v69_v0, %v69_v0  ;;  %vm74_vm1 = vcmp.ne.f32.partialorder %v70_v1, %v70_v1  ;;  %s272_s1 = smov [#allocation8]   ;;  %s273_s11 = smov [#allocation7]  }
  0x29   :  { %vm75_vm3 = vmxor %vm73_vm0, %vm270_vm2  ;;  %s142_s10 = sshll.u32 %s272_s1, 4  ;;  %s132_s12 = sshll.u32 %s273_s11, 4  ;;  %s143_s10 = int_to_ptr.vmem [resolvable:$true] %s142_s10  ;;  %s133_s12 = int_to_ptr.vmem [resolvable:$true] %s132_s12 }
  0x2a   :  { %vm76_vm4 = vmxor %vm74_vm1, %vm270_vm2  ;;  %v77_v4 = vsel %vm75_vm3, %v69_v0, %v71_v2  ;;  %v160_v6 = vsel %vm75_vm3, 1.0, %v271_v5  ;;  %s214_s13 = scalar_lea.vmem %s143_s10, 128  ;;  %p219_p3 = scmp.lt.s32.totalorder %s143_s10, %s143_s10 }
  0x2b   :  { %v78_v7 = vsel %vm76_vm4, %v70_v1, %v72_v3  ;;  %v79_v8 = vsub.f32 %v77_v4, %v71_v2  ;;  %v161_v9 = vsel %vm76_vm4, 1.0, %v271_v5  ;;  %p215_p2 = scmp.ne.s32.totalorder %s143_s10, %s214_s13  ;;  %p220_p4 = scmp.lt.s32.totalorder %s214_s13, %s214_s13 }
  0x2c   :  { %v80_v10 = vsub.f32 %v78_v7, %v72_v3  ;;  %v99_v11 = vadd.f32 %v161_v9, %v160_v6 }
  0x2d   :  { %v93_v12 = vmul.f32 %v79_v8, %v79_v8  ;;  %p221_p5 = por %p220_p4, %p219_p3 }
  0x2e   :  { %v94_v13 = vmul.f32 %v80_v10, %v80_v10  ;;  %101 = vst [vmem:[#allocation8] sm:$0xff] %v99_v11 }
  0x2f   :  { %p222_p6 = pnand %p221_p5, %p215_p2 }
  0x30   :  { %v95_v14 = vadd.f32 %v94_v13, %v93_v12 }
  0x31   :  { %225 = shalt.err (!%p222_p6)
}
  0x32   :  { %s226_s16 = scalar_lea.hbm %s345_s3, 128 }
  0x33   :  { %p227_p7 = scmp.ne.s32.totalorder %s345_s3, %s226_s16  ;;  %p230_p8 = scmp.lt.u32.totalorder %s226_s16, %s345_s3 }
  0x35   :  { %p232_p9 = pnand %p230_p8, %p227_p7 }
  0x37   :  { %235 = shalt.err (!%p232_p9)
}
  0x38   :  { %145 = dma.vmem_to_hbm [thread:$0]  %s143_s10, 128, %s345_s3, [#allocation9]   ;;  %97 = vst [vmem:[#allocation7] sm:$0xff] %v95_v14 }
  0x39   :  { %s236_s23 = scalar_lea.vmem %s133_s12, 128  ;;  %p241_p11 = scmp.lt.s32.totalorder %s133_s12, %s133_s12 }
  0x3a   :  { %p237_p10 = scmp.ne.s32.totalorder %s133_s12, %s236_s23  ;;  %p242_p12 = scmp.lt.s32.totalorder %s236_s23, %s236_s23 }
  0x3c   :  { %p243_p13 = por %p242_p12, %p241_p11 }
  0x3e   :  { %p244_p0 = pnand %p243_p13, %p237_p10 }
  0x40   :  { %247 = shalt.err (!%p244_p0)
}
  0x41   :  { %s248_s26 = scalar_lea.hbm %s344_s2, 128 }
  0x42   :  { %p249_p1 = scmp.ne.s32.totalorder %s344_s2, %s248_s26  ;;  %p252_p2 = scmp.lt.u32.totalorder %s248_s26, %s344_s2 }
  0x44   :  { %p254_p3 = pnand %p252_p2, %p249_p1 }
  0x46   :  { %257 = shalt.err (!%p254_p3)
}
  0x47   :  { %135 = dma.vmem_to_hbm [thread:$0]  %s133_s12, 128, %s344_s2, [#allocation4]  }
  0x48   :  { %262 = dma.done.wait [#allocation4], 128  }
  0x49   :  { %263 = vsyncadd [#allocation4], 4294967168 }
  0x4a   :  { %264 = dma.done.wait [#allocation9], 128  }
  0x4b   :  { %265 = vsyncadd [#allocation9], 4294967168 }
  0x4c   :  { %152 = vsyncpa [#allocation3], 1 }
  0x4d   :  { %153 = vsyncpa [#allocation6], 1 }
  0x4e   :  { %154 = vsyncpa [#allocation4], 1 }
  0x4f   :  { %155 = vsyncpa [#allocation9], 1 }

</bundles_post_ra>
